<compile_context>
chip_gen: v7x
topology: tpu7x:2x2x1
jax: 0.10.0
libtpu: 0.0.40
codegen_flags: <defaults>
</compile_context>

<pallas_src>
import functools

import jax
import jax.numpy as jnp
from jax.experimental import pallas as pl
from jax.experimental.pallas import tpu as pltpu

STATE_DIM = 3      # Pendulum-v1 observation_space.shape[0]
ACTION_DIM = 1     # Pendulum-v1 action_space.shape[0]
HIDDEN = 64

LANE = 128         # TPU lane width; hidden/state dims are zero-padded to this.
SUB = 8            # sublane alignment

# Row offsets of each section inside the packed parameter slab ([P_ROWS, LANE]).
W1_ROW = 0                   # [LANE, LANE]  rows 0..STATE_DIM-1 hold W1
B1_ROW = W1_ROW + LANE       # [SUB,  LANE]  row 0 holds b1
W2_ROW = B1_ROW + SUB        # [LANE, LANE]  rows 0..HIDDEN-1 hold W2
B2_ROW = W2_ROW + LANE       # [SUB,  LANE]  row 0 holds b2
W3_ROW = B2_ROW + SUB        # [SUB,  LANE]  row 0 = w3 (as a row), row 1 = b3 (all lanes)
P_ROWS = W3_ROW + SUB        # total slab rows (multiple of 8)

MXU_DTYPE = jnp.bfloat16     # matmul operand dtype (accumulation stays f32)


def actor_kernel(x_ref, p_ref, o_ref):
    x = x_ref[...]                                   # [TB, 128] f32 (state lane-padded)

    # Static, sublane-aligned views into the single packed parameter slab.
    w1 = p_ref[W1_ROW:W1_ROW + LANE, :]              # [128, 128]
    b1 = p_ref[B1_ROW:B1_ROW + SUB, :][0:1, :]       # [1, 128]
    w2 = p_ref[W2_ROW:W2_ROW + LANE, :]              # [128, 128]
    b2 = p_ref[B2_ROW:B2_ROW + SUB, :][0:1, :]       # [1, 128]
    tail = p_ref[W3_ROW:W3_ROW + SUB, :]             # [8, 128]
    w3 = tail[0:1, :]                                # [1, 128] (fc3 weight as a row)
    b3 = tail[1:2, :]                                # [1, 128] (fc3 bias replicated on lanes)

    # fc1 / fc2 on the MXU: bf16 operands, f32 accumulation; activations in f32.
    h1 = jnp.dot(x.astype(MXU_DTYPE), w1.astype(MXU_DTYPE),
                 preferred_element_type=jnp.float32)
    h1 = jnp.maximum(h1 + b1, 0.0)                   # ReLU (padded lanes stay 0)
    h2 = jnp.dot(h1.astype(MXU_DTYPE), w2.astype(MXU_DTYPE),
                 preferred_element_type=jnp.float32)
    h2 = jnp.maximum(h2 + b2, 0.0)                   # ReLU

    # fc3 has a single output column -> VPU multiply + lane reduction, no MXU pass.
    h3 = jnp.sum(h2 * w3, axis=-1, keepdims=True)    # [TB, 1] f32
    # b3 is replicated on all lanes, so the add broadcasts the scalar action to a
    # lane-dense [TB, 128] block -> unmasked store; wrapper slices lane 0 outside.
    o_ref[...] = jnp.tanh(h3 + b3)


def _round_up(n, m):
    return (n + m - 1) // m * m


@functools.partial(jax.jit, static_argnames=("block_b",))
def actor_forward(x, packed_params, block_b=256):
    """x: [B, STATE_DIM] f32; packed_params: [P_ROWS, LANE] f32 from pack_params()."""
    B = x.shape[0]
    tile_b = min(block_b, _round_up(B, SUB))
    b_pad = _round_up(B, tile_b)

    # Lane/sublane-pad the state batch in the wrapper (zeros are harmless: the
    # corresponding padded weight rows are zero too).
    x_pad = jnp.zeros((b_pad, LANE), jnp.float32).at[:B, :STATE_DIM].set(x)

    out = pl.pallas_call(
        actor_kernel,
        out_shape=jax.ShapeDtypeStruct((b_pad, LANE), jnp.float32),
        grid=(b_pad // tile_b,),
        in_specs=[
            pl.BlockSpec((tile_b, LANE), lambda i: (i, 0)),
            # Whole parameter slab; constant block index -> fetched once and kept
            # resident in VMEM across the batch grid.
            pl.BlockSpec((P_ROWS, LANE), lambda i: (0, 0)),
        ],
        out_specs=pl.BlockSpec((tile_b, LANE), lambda i: (i, 0)),
        compiler_params=pltpu.CompilerParams(dimension_semantics=("parallel",)),
    )(x_pad, packed_params)
    return out[:B, :ACTION_DIM]


def init_params(key):
    """PyTorch-style Linear init: U(-1/sqrt(fan_in), 1/sqrt(fan_in)).

    Weights stored as [in, out] (transposed vs. torch's [out, in]); biases [1, out].
    """
    def linear(k, fan_in, fan_out):
        kw, kb = jax.random.split(k)
        bound = 1.0 / jnp.sqrt(fan_in)
        w = jax.random.uniform(kw, (fan_in, fan_out), jnp.float32, -bound, bound)
        b = jax.random.uniform(kb, (1, fan_out), jnp.float32, -bound, bound)
        return w, b

    k1, k2, k3 = jax.random.split(key, 3)
    w1, b1 = linear(k1, STATE_DIM, HIDDEN)
    w2, b2 = linear(k2, HIDDEN, HIDDEN)
    w3, b3 = linear(k3, HIDDEN, ACTION_DIM)
    return (w1, b1, w2, b2, w3, b3)


def pack_params(params):
    """Pack all six parameters into one 128-lane, zero-padded f32 slab.

    Done ONCE at init; per forward call only this single array is passed to the
    kernel (one parameter DMA instead of six).
    """
    w1, b1, w2, b2, w3, b3 = params
    slab = jnp.zeros((P_ROWS, LANE), jnp.float32)
    slab = slab.at[W1_ROW:W1_ROW + STATE_DIM, :HIDDEN].set(w1)
    slab = slab.at[B1_ROW:B1_ROW + 1, :HIDDEN].set(b1)
    slab = slab.at[W2_ROW:W2_ROW + HIDDEN, :HIDDEN].set(w2)
    slab = slab.at[B2_ROW:B2_ROW + 1, :HIDDEN].set(b2)
    slab = slab.at[W3_ROW:W3_ROW + 1, :HIDDEN].set(w3.T)                           # fc3 weight row
    slab = slab.at[W3_ROW + 1:W3_ROW + 2, :].set(jnp.broadcast_to(b3, (1, LANE)))  # fc3 bias, all lanes
    return slab


def actor_ref(x, params, mxu_dtype=jnp.float32):
    """Pure-JAX reference. mxu_dtype=f32 reproduces the PyTorch forward exactly;
    mxu_dtype=bf16 mirrors the kernel's MXU operand casts (f32 accumulation)."""
    w1, b1, w2, b2, w3, b3 = params

    def mm(a, w):
        return jnp.dot(a.astype(mxu_dtype), w.astype(mxu_dtype),
                       preferred_element_type=jnp.float32)

    h = jax.nn.relu(mm(x, w1) + b1)
    h = jax.nn.relu(mm(h, w2) + b2)
    return jnp.tanh(h @ w3 + b3)     # fc3 stays f32 in the kernel too


if __name__ == "__main__":
    key = jax.random.PRNGKey(0)
    pkey, xkey = jax.random.split(key)
    params = init_params(pkey)
    packed = pack_params(params)     # packed once, reused for every forward call

    B = 8
    x = jax.random.normal(xkey, (B, STATE_DIM), jnp.float32)

    out = jax.block_until_ready(actor_forward(x, packed))
    assert out.shape == (B, ACTION_DIM), out.shape

    # (1) tight check vs. a reference mirroring the kernel's bf16 MXU operands,
    # (2) semantic check vs. the exact f32 PyTorch forward.
    ref_mxu = actor_ref(x, params, mxu_dtype=MXU_DTYPE)
    ref_f32 = actor_ref(x, params)
    assert jnp.allclose(out, ref_mxu, atol=1e-4, rtol=0.0), float(jnp.max(jnp.abs(out - ref_mxu)))
    assert jnp.allclose(out, ref_f32, atol=2e-2, rtol=0.0), float(jnp.max(jnp.abs(out - ref_f32)))

    print("KERNEL_OK")
</pallas_src>

<mosaic_0001>
module attributes {stable_mosaic.version = 11 : i64} {
  func.func @actor_kernel(%arg0: i32, %arg1: memref<8x128xf32, #tpu.memory_space<vmem>>, %arg2: memref<280x128xf32, #tpu.memory_space<vmem>>, %arg3: memref<8x128xf32, #tpu.memory_space<vmem>>) attributes {dimension_semantics = [#tpu.dimension_semantics<parallel>], iteration_bounds = array<i64: 1>, scalar_prefetch = 0 : i64, scratch_operands = 0 : i64, tpu.core_type = #tpu.core_type<tc>, window_params = [{transform_indices = @transform_0, window_bounds = array<i64: 8, 128>}, {pipeline_mode = #tpu.pipeline_mode<synchronous>, transform_indices = @transform_1, window_bounds = array<i64: 280, 128>}, {transform_indices = @transform_2, window_bounds = array<i64: 8, 128>}]} {
    %c0 = arith.constant 0 : index
    %c0_0 = arith.constant 0 : index
    %0 = vector.load %arg1[%c0, %c0_0] : memref<8x128xf32, #tpu.memory_space<vmem>>, vector<8x128xf32>
    %c0_1 = arith.constant 0 : index
    %c0_2 = arith.constant 0 : index
    %1 = vector.load %arg2[%c0_1, %c0_2] : memref<280x128xf32, #tpu.memory_space<vmem>>, vector<128x128xf32>
    %c128 = arith.constant 128 : index
    %c0_3 = arith.constant 0 : index
    %2 = vector.load %arg2[%c128, %c0_3] : memref<280x128xf32, #tpu.memory_space<vmem>>, vector<8x128xf32>
    %3 = vector.extract_strided_slice %2 {offsets = [0, 0], sizes = [1, 128], strides = [1, 1]} : vector<8x128xf32> to vector<1x128xf32>
    %c136 = arith.constant 136 : index
    %c0_4 = arith.constant 0 : index
    %4 = vector.load %arg2[%c136, %c0_4] : memref<280x128xf32, #tpu.memory_space<vmem>>, vector<128x128xf32>
    %c264 = arith.constant 264 : index
    %c0_5 = arith.constant 0 : index
    %5 = vector.load %arg2[%c264, %c0_5] : memref<280x128xf32, #tpu.memory_space<vmem>>, vector<8x128xf32>
    %6 = vector.extract_strided_slice %5 {offsets = [0, 0], sizes = [1, 128], strides = [1, 1]} : vector<8x128xf32> to vector<1x128xf32>
    %c272 = arith.constant 272 : index
    %c0_6 = arith.constant 0 : index
    %7 = vector.load %arg2[%c272, %c0_6] : memref<280x128xf32, #tpu.memory_space<vmem>>, vector<8x128xf32>
    %8 = vector.extract_strided_slice %7 {offsets = [0, 0], sizes = [1, 128], strides = [1, 1]} : vector<8x128xf32> to vector<1x128xf32>
    %9 = vector.extract_strided_slice %7 {offsets = [1, 0], sizes = [1, 128], strides = [1, 1]} : vector<8x128xf32> to vector<1x128xf32>
    %10 = arith.truncf %0 : vector<8x128xf32> to vector<8x128xbf16>
    %11 = arith.truncf %1 : vector<128x128xf32> to vector<128x128xbf16>
    %cst = arith.constant dense<0.000000e+00> : vector<8x128xf32>
    %12 = tpu.matmul %10, %11, %cst {dimension_numbers = #tpu.dot_dimension_numbers<[1], [0], [0], [1], [0, 0, 1, 1], [], []>} : vector<8x128xbf16>, vector<128x128xbf16>, vector<8x128xf32> -> vector<8x128xf32>
    %13 = vector.broadcast %3 : vector<1x128xf32> to vector<8x128xf32>
    %14 = arith.addf %12, %13 : vector<8x128xf32>
    %cst_7 = arith.constant 0.000000e+00 : f32
    %15 = vector.broadcast %cst_7 : f32 to vector<8x128xf32>
    %16 = arith.maximumf %14, %15 : vector<8x128xf32>
    %17 = arith.truncf %16 : vector<8x128xf32> to vector<8x128xbf16>
    %18 = arith.truncf %4 : vector<128x128xf32> to vector<128x128xbf16>
    %cst_8 = arith.constant dense<0.000000e+00> : vector<8x128xf32>
    %19 = tpu.matmul %17, %18, %cst_8 {dimension_numbers = #tpu.dot_dimension_numbers<[1], [0], [0], [1], [0, 0, 1, 1], [], []>} : vector<8x128xbf16>, vector<128x128xbf16>, vector<8x128xf32> -> vector<8x128xf32>
    %20 = vector.broadcast %6 : vector<1x128xf32> to vector<8x128xf32>
    %21 = arith.addf %19, %20 : vector<8x128xf32>
    %cst_9 = arith.constant 0.000000e+00 : f32
    %22 = vector.broadcast %cst_9 : f32 to vector<8x128xf32>
    %23 = arith.maximumf %21, %22 : vector<8x128xf32>
    %24 = vector.broadcast %8 : vector<1x128xf32> to vector<8x128xf32>
    %25 = arith.mulf %23, %24 : vector<8x128xf32>
    %cst_10 = arith.constant dense<0.000000e+00> : vector<8xf32>
    %26 = vector.multi_reduction <add>, %25, %cst_10 [1] : vector<8x128xf32> to vector<8xf32>
    %27 = vector.shape_cast %26 : vector<8xf32> to vector<8x1xf32>
    %28 = vector.broadcast %27 : vector<8x1xf32> to vector<8x128xf32>
    %29 = vector.broadcast %9 : vector<1x128xf32> to vector<8x128xf32>
    %30 = arith.addf %28, %29 : vector<8x128xf32>
    %31 = math.tanh %30 : vector<8x128xf32>
    %c0_11 = arith.constant 0 : index
    %c0_12 = arith.constant 0 : index
    %32 = vector.load %arg3[%c0_11, %c0_12] : memref<8x128xf32, #tpu.memory_space<vmem>>, vector<8x128xf32>
    tpu.vector_store %arg3[%c0_11, %c0_12], %31 {strides = array<i32>} : memref<8x128xf32, #tpu.memory_space<vmem>>, vector<8x128xf32>,
    return
  }
  func.func @transform_0(%arg0: i32) -> (i32, i32) {
    %c0_i32 = arith.constant 0 : i32
    %c0_i32_0 = arith.constant 0 : i32
    return %arg0, %c0_i32 : i32, i32
  }
  func.func @transform_1(%arg0: i32) -> (i32, i32) {
    %c0_i32 = arith.constant 0 : i32
    %c0_i32_0 = arith.constant 0 : i32
    %c0_i32_1 = arith.constant 0 : i32
    return %c0_i32, %c0_i32_0 : i32, i32
  }
  func.func @transform_2(%arg0: i32) -> (i32, i32) {
    %c0_i32 = arith.constant 0 : i32
    %c0_i32_0 = arith.constant 0 : i32
    return %arg0, %c0_i32 : i32, i32
  }
}

</mosaic_0001>

<bundles_post_ra>
// kernel: actor_forward.1
= control target key start
LH: loop header
LB: loop body
LE: loop exit
PB: predicated region body
PF: predicated region fallthrough
CT: control target
= control target key end

     0   :  { %7 = vsyncpa [#allocation3], 0  ;;  %s278_s9 = smov [#allocation2]   ;;  %s334_s0 = inlined_call_operand.vmem [shape: f32[8,128], index: 0, kind: input, shape index: {}]   ;;  %s335_s1 = inlined_call_operand.hbm [shape: f32[280,128], index: 1, kind: input, shape index: {}]   ;;  %s336_s2 = inlined_call_operand.vmem [shape: f32[8,128], index: 2, kind: output, shape index: {}]  }
   0x1   :  { %s15_s10 = sshll.u32 %s278_s9, 4  ;;  %s254_s13 = scalar_lea.hbm %s335_s1, 4480  ;;  %s16_s10 = int_to_ptr.vmem [resolvable:$true] %s15_s10 }
   0x2   :  { %p255_p0 = scmp.ne.s32.totalorder %s335_s1, %s254_s13  ;;  %p258_p1 = scmp.lt.u32.totalorder %s254_s13, %s335_s1 }
   0x4   :  { %p260_p2 = pnand %p258_p1, %p255_p0 }
   0x6   :  { %263 = shalt.err (!%p260_p2)
}
   0x7   :  { %s264_s18 = scalar_lea.vmem %s16_s10, 4480  ;;  %p269_p4 = scmp.lt.s32.totalorder %s16_s10, %s16_s10 }
   0x8   :  { %p265_p3 = scmp.ne.s32.totalorder %s16_s10, %s264_s18  ;;  %p270_p5 = scmp.lt.s32.totalorder %s264_s18, %s264_s18 }
   0xa   :  { %p271_p6 = por %p270_p5, %p269_p4 }
   0xc   :  { %p272_p7 = pnand %p271_p6, %p265_p3 }
   0xe   :  { %275 = shalt.err (!%p272_p7)
}
   0xf   :  { %s279_s19 = smov 128   ;;  %s280_s20 = smov 8  }
  0x10   :  { %21 = dma.hbm_to_vmem [thread:$0]  %s335_s1, 4480, %s16_s10, [#allocation3], %s279_s19, %s279_s19, %s280_s20  }
  0x11   :  { %276 = dma.done.wait [#allocation3], 4480  }
  0x12   :  { %277 = vsyncadd [#allocation3], 4294962816  ;;  %v281_v0 = vmov 0.0   ;;  %vm282_vm0 = vmmov 0   ;;  %v27_v1 = vld [vmem:[#allocation2] sm:$0xff]  ;;  %v28_v2 = vld [vmem:[#allocation2 + $0x8] sm:$0xff]  ;;  %v71_v51 = vlaneseq }
  0x13   :  { %207 = vmatprep.subr.bf16.mxu0 %v281_v0  ;;  %223 = vmatprep.mubr.msk.bf16.mxu0 %vm282_vm0, %v281_v0  ;;  %v29_v3 = vld [vmem:[#allocation2 + $0x10] sm:$0xff]  ;;  %v63_v4 = vpack.c.bf16 %v28_v2, %v27_v1  ;;  %v30_v5 = vld [vmem:[#allocation2 + $0x18] sm:$0xff]  ;;  %v31_v7 = vld [vmem:[#allocation2 + $0x20] sm:$0xff] }
  0x14   :  { %227 = vmatprep.subr.bf16.mxu1 %v281_v0  ;;  %243 = vmatprep.mubr.msk.bf16.mxu1 %vm282_vm0, %v281_v0  ;;  %v64_v6 = vpack.c.bf16 %v30_v5, %v29_v3  ;;  %v32_v8 = vld [vmem:[#allocation2 + $0x28] sm:$0xff]  ;;  %v45_v10 = vld [vmem:[#allocation2 + $0x90] sm:$0xff]  ;;  %v46_v11 = vld [vmem:[#allocation2 + $0x98] sm:$0xff]  ;;  %v72_v52 = vshrl.u32 %v71_v51, 7 }
  0x15   :  { %208 = vmatpush3.bf16.msra.mxu0 %v63_v4  ;;  %v44_v9 = vld [vmem:[#allocation2 + $0x88] sm:$0xff]  ;;  %v47_v12 = vld [vmem:[#allocation2 + $0xa0] sm:$0xff]  ;;  %v65_v13 = vpack.c.bf16 %v32_v8, %v31_v7  ;;  %v33_v15 = vld [vmem:[#allocation2 + $0x30] sm:$0xff] }
  0x16   :  { %209 = vmatprep.subr.bf16.mxu0 %v281_v0  ;;  %v117_v14 = vpack.c.bf16 %v45_v10, %v44_v9  ;;  %v34_v16 = vld [vmem:[#allocation2 + $0x38] sm:$0xff]  ;;  %v118_v17 = vpack.c.bf16 %v47_v12, %v46_v11  ;;  %v48_v18 = vld [vmem:[#allocation2 + $0xa8] sm:$0xff]  ;;  %v49_v19 = vld [vmem:[#allocation2 + $0xb0] sm:$0xff]  ;;  %v73_v53 = vsub.s32 0, %v72_v52  ;;  %v179_v10 = vsub.s32 1, %v72_v52 }
  0x17   :  { %v66_v20 = vpack.c.bf16 %v34_v16, %v33_v15  ;;  %v35_v21 = vld [vmem:[#allocation2 + $0x40] sm:$0xff]  ;;  %v36_v22 = vld [vmem:[#allocation2 + $0x48] sm:$0xff]  ;;  %v119_v23 = vpack.c.bf16 %v49_v19, %v48_v18  ;;  %v50_v24 = vld [vmem:[#allocation2 + $0xb8] sm:$0xff] }
  0x18   :  { %228 = vmatpush3.bf16.msra.mxu1 %v117_v14  ;;  %v51_v25 = vld [vmem:[#allocation2 + $0xc0] sm:$0xff]  ;;  %v67_v26 = vpack.c.bf16 %v36_v22, %v35_v21  ;;  %v37_v27 = vld [vmem:[#allocation2 + $0x50] sm:$0xff]  ;;  %v38_v28 = vld [vmem:[#allocation2 + $0x58] sm:$0xff] }
  0x19   :  { %210 = vmatpush3.bf16.msra.mxu0 %v64_v6  ;;  %229 = vmatprep.subr.bf16.mxu1 %v281_v0  ;;  %v120_v29 = vpack.c.bf16 %v51_v25, %v50_v24  ;;  %v52_v30 = vld [vmem:[#allocation2 + $0xc8] sm:$0xff]  ;;  %v53_v31 = vld [vmem:[#allocation2 + $0xd0] sm:$0xff]  ;;  %v68_v32 = vpack.c.bf16 %v38_v28, %v37_v27  ;;  %v39_v33 = vld [vmem:[#allocation2 + $0x60] sm:$0xff] }
  0x1a   :  { %211 = vmatprep.subr.bf16.mxu0 %v281_v0  ;;  %v40_v34 = vld [vmem:[#allocation2 + $0x68] sm:$0xff]  ;;  %v121_v35 = vpack.c.bf16 %v53_v31, %v52_v30  ;;  %v54_v36 = vld [vmem:[#allocation2 + $0xd8] sm:$0xff]  ;;  %v55_v37 = vld [vmem:[#allocation2 + $0xe0] sm:$0xff] }
  0x1b   :  { %v69_v38 = vpack.c.bf16 %v40_v34, %v39_v33  ;;  %v41_v39 = vld [vmem:[#allocation2 + $0x70] sm:$0xff]  ;;  %v42_v40 = vld [vmem:[#allocation2 + $0x78] sm:$0xff]  ;;  %v122_v41 = vpack.c.bf16 %v55_v37, %v54_v36  ;;  %v26_v43 = vld [vmem:[%s334_s0] sm:$0xff] }
  0x1c   :  { %230 = vmatpush3.bf16.msra.mxu1 %v118_v17  ;;  %v70_v42 = vpack.c.bf16 %v42_v40, %v41_v39  ;;  %v62_v44 = vpack.c.bf16 %v26_v43, %v26_v43  ;;  %v56_v45 = vld [vmem:[#allocation2 + $0xe8] sm:$0xff]  ;;  %v57_v46 = vld [vmem:[#allocation2 + $0xf0] sm:$0xff]  ;;  %v58_v48 = vld [vmem:[#allocation2 + $0xf8] sm:$0xff] }
  0x1d   :  { %212 = vmatpush3.bf16.msra.mxu0 %v65_v13  ;;  %231 = vmatprep.subr.bf16.mxu1 %v281_v0  ;;  %v123_v47 = vpack.c.bf16 %v57_v46, %v56_v45  ;;  %v59_v49 = vld [vmem:[#allocation2 + $0x100] sm:$0xff]  ;;  %v60_v63 = vld [vmem:[#allocation2 + $0x108] sm:$0xff] }
  0x1e   :  { %213 = vmatprep.subr.bf16.mxu0 %v281_v0  ;;  %v124_v50 = vpack.c.bf16 %v59_v49, %v58_v48  ;;  %v43_v54 = vld [vmem:[#allocation2 + $0x80] sm:$0xff]  ;;  %v128_v1 = vrot.slane %v60_v63, %v73_v53 }
  0x1f   :  { %v74_v55 = vrot.slane %v43_v54, %v73_v53 }
  0x20   :  { %232 = vmatpush3.bf16.msra.mxu1 %v119_v23 }
  0x21   :  { %214 = vmatpush3.bf16.msra.mxu0 %v66_v20  ;;  %233 = vmatprep.subr.bf16.mxu1 %v281_v0 }
  0x22   :  { %215 = vmatprep.subr.bf16.mxu0 %v281_v0 }
  0x24   :  { %234 = vmatpush3.bf16.msra.mxu1 %v120_v29 }
  0x25   :  { %216 = vmatpush3.bf16.msra.mxu0 %v67_v26  ;;  %235 = vmatprep.subr.bf16.mxu1 %v281_v0 }
  0x26   :  { %217 = vmatprep.subr.bf16.mxu0 %v281_v0 }
  0x28   :  { %236 = vmatpush3.bf16.msra.mxu1 %v121_v35 }
  0x29   :  { %218 = vmatpush3.bf16.msra.mxu0 %v68_v32  ;;  %237 = vmatprep.subr.bf16.mxu1 %v281_v0 }
  0x2a   :  { %219 = vmatprep.subr.bf16.mxu0 %v281_v0 }
  0x2c   :  { %238 = vmatpush3.bf16.msra.mxu1 %v122_v41 }
  0x2d   :  { %220 = vmatpush3.bf16.msra.mxu0 %v69_v38  ;;  %239 = vmatprep.subr.bf16.mxu1 %v281_v0 }
  0x2e   :  { %221 = vmatprep.subr.bf16.mxu0 %v281_v0 }
  0x30   :  { %240 = vmatpush3.bf16.msra.mxu1 %v123_v47 }
  0x31   :  { %222 = vmatpush3.bf16.msra.mxu0 %v70_v42  ;;  %241 = vmatprep.subr.bf16.mxu1 %v281_v0  ;;  %v61_v0 = vld [vmem:[#allocation2 + $0x110] sm:$0xff] }
  0x32   :  { %v173_v5 = vrot.slane %v61_v0, %v73_v53  ;;  %v180_v11 = vrot.slane %v61_v0, %v179_v10 }
  0x34   :  { %224 = vmatmul.mubr.bf16.vlgmr.msra.gmra.mrb[0].mxu0 %v62_v44  ;;  %242 = vmatpush3.bf16.msra.mxu1 %v124_v50 }
 0x107   :  { %v109_v56 = vpop.f32.mrb[0].mxu0 }
 0x108   :  { %v110_v57 = vadd.f32 %v109_v56, %v74_v55  ;;  %v225_v58 = vpop.f32.mrb[1].mxu0 }
 0x109   :  { %v112_v59 = vpop.f32.mrb[2].mxu0 }
 0x10a   :  { %v115_v60 = vmax.f32 %v110_v57, 0.0  ;;  %v226_v61 = vpop.f32.mrb[3].mxu0 }
 0x10c   :  { %v116_v62 = vpack.c.bf16 %v115_v60, %v115_v60 }
 0x10e   :  { %244 = vmatmul.mubr.bf16.vlgmr.msra.gmra.mrb[0].mxu1 %v116_v62 }
 0x1e1   :  { %v163_v2 = vpop.f32.mrb[0].mxu1 }
 0x1e2   :  { %v164_v3 = vadd.f32 %v163_v2, %v128_v1  ;;  %v245_v4 = vpop.f32.mrb[1].mxu1 }
 0x1e3   :  { %v166_v6 = vpop.f32.mrb[2].mxu1 }
 0x1e4   :  { %v169_v7 = vmax.f32 %v164_v3, 0.0  ;;  %v246_v8 = vpop.f32.mrb[3].mxu1 }
 0x1e6   :  { %v174_v9 = vmul.f32 %v173_v5, %v169_v7 }
 0x1e8   :  { %175 = vadd.xlane.f32.xlu0 %v174_v9 }
 0x275   :  { %v176_v12 = vpop.xlane.xlu0 %175 }
 0x276   :  { %v181_v13 = vadd.f32 %v180_v11, %v176_v12 }
 0x278   :  { %252 = vtanh.f32 %v181_v13 }
 0x282   :  { %v253_v14 = vpop.eup %252 }
 0x283   :  { %183 = vst [vmem:[%s336_s2] sm:$0xff] %v253_v14 }
 0x284   :  { %188 = vsyncpa [#allocation3], 1 }

</bundles_post_ra>
